<compile_context>
chip_gen: v5e
topology: v5e:2x2
jax: 0.10.0
libtpu: 0.0.40
codegen_flags: <defaults>
</compile_context>

<pallas_src>
import functools

import jax
import jax.numpy as jnp
from jax.experimental import pallas as pl
from jax.experimental.pallas import tpu as pltpu


# ----------------------------------------------------------------------------
# Pallas kernel: fused channel attention for one batch element.
# ----------------------------------------------------------------------------
def _channel_attention_kernel(x_ref, w1_ref, b1_ref, w2_ref, b2_ref, o_ref, *,
                              inv_hw):
    """x_ref: (1, C, HW) lane-dense block.  w1: (Cs, C), w2: (C, Cs)."""
    x = x_ref[0].astype(jnp.float32)                          # (C, HW) in VMEM
    # Global average pool (cross-lane reduce on the XLU).
    pooled = jnp.sum(x, axis=1, keepdims=True) * inv_hw       # (C, 1)
    # 1x1 conv (squeeze) + ReLU.
    h = jnp.dot(w1_ref[...], pooled,
                preferred_element_type=jnp.float32) + b1_ref[...]   # (Cs, 1)
    h = jnp.maximum(h, 0.0)
    # 1x1 conv (excite) + sigmoid (EUP).
    y = jnp.dot(w2_ref[...], h,
                preferred_element_type=jnp.float32) + b2_ref[...]   # (C, 1)
    y = jax.nn.sigmoid(y)
    # Gate: per-channel scale broadcast along the lane (HW) axis.
    o_ref[0] = (x * y).astype(o_ref.dtype)


def channel_attention(x_nchw, w1, b1, w2, b2):
    """Fused ChannelAttention.

    x_nchw: (N, C, H, W)  -- same layout as the PyTorch module.
    w1:     (Cs, C)   b1: (Cs,)   (PyTorch Conv2d weight (Cs, C, 1, 1) squeezed)
    w2:     (C, Cs)   b2: (C,)
    """
    N, C, H, W = x_nchw.shape
    HW = H * W
    Cs = w1.shape[0]

    # Free reshape (no transpose): channels stay on sublanes, H*W on lanes.
    x = x_nchw.reshape(N, C, HW)
    b1c = b1.reshape(Cs, 1).astype(jnp.float32)
    b2c = b2.reshape(C, 1).astype(jnp.float32)
    w1c = w1.astype(jnp.float32)
    w2c = w2.astype(jnp.float32)

    kernel = functools.partial(_channel_attention_kernel, inv_hw=1.0 / HW)

    # Double-buffered input + output blocks plus weights, with headroom.
    block_bytes = C * HW * x.dtype.itemsize
    vmem_limit = int(max(16 * 1024 * 1024, 6 * block_bytes))

    out = pl.pallas_call(
        kernel,
        out_shape=jax.ShapeDtypeStruct((N, C, HW), x.dtype),
        grid=(N,),
        in_specs=[
            pl.BlockSpec((1, C, HW), lambda n: (n, 0, 0)),
            pl.BlockSpec((Cs, C), lambda n: (0, 0)),
            pl.BlockSpec((Cs, 1), lambda n: (0, 0)),
            pl.BlockSpec((C, Cs), lambda n: (0, 0)),
            pl.BlockSpec((C, 1), lambda n: (0, 0)),
        ],
        out_specs=pl.BlockSpec((1, C, HW), lambda n: (n, 0, 0)),
        compiler_params=pltpu.CompilerParams(
            dimension_semantics=("parallel",),
            vmem_limit_bytes=vmem_limit),
    )(x, w1c, b1c, w2c, b2c)

    return out.reshape(N, C, H, W)


# ----------------------------------------------------------------------------
# Pure-JAX reference (mirrors the PyTorch module) for correctness checking.
# ----------------------------------------------------------------------------
def channel_attention_ref(x, w1, b1, w2, b2):
    pooled = jnp.mean(x, axis=(2, 3))                       # (N, C)
    h = jnp.maximum(pooled @ w1.T + b1[None, :], 0.0)       # (N, Cs)
    y = jax.nn.sigmoid(h @ w2.T + b2[None, :])              # (N, C)
    return x * y[:, :, None, None]


# ----------------------------------------------------------------------------
# Demo
# ----------------------------------------------------------------------------
if __name__ == "__main__":
    num_feat = 16
    squeeze_factor = 4
    cs = num_feat // squeeze_factor
    N, H, W = 2, 16, 16

    key = jax.random.PRNGKey(0)
    kx, kw1, kb1, kw2, kb2 = jax.random.split(key, 5)

    x = jax.random.normal(kx, (N, num_feat, H, W), jnp.float32)
    # Parameters in PyTorch Conv2d (out, in) layout (1x1 kernels squeezed).
    w1 = jax.random.normal(kw1, (cs, num_feat), jnp.float32) * 0.1
    b1 = jax.random.normal(kb1, (cs,), jnp.float32) * 0.1
    w2 = jax.random.normal(kw2, (num_feat, cs), jnp.float32) * 0.1
    b2 = jax.random.normal(kb2, (num_feat,), jnp.float32) * 0.1

    fwd = jax.jit(channel_attention)
    out = fwd(x, w1, b1, w2, b2)
    out = jax.block_until_ready(out)

    ref = channel_attention_ref(x, w1, b1, w2, b2)

    assert out.shape == x.shape, out.shape
    assert bool(jnp.all(jnp.isfinite(out)))
    assert bool(jnp.allclose(out, ref, atol=1e-5, rtol=1e-5)), \
        float(jnp.max(jnp.abs(out - ref)))
    print("KERNEL_OK")
</pallas_src>

<mosaic_0001>
module attributes {stable_mosaic.version = 11 : i64} {
  func.func @_channel_attention_kernel(%arg0: i32, %arg1: memref<1x16x256xf32, #tpu.memory_space<vmem>>, %arg2: memref<4x16xf32, #tpu.memory_space<vmem>>, %arg3: memref<4x1xf32, #tpu.memory_space<vmem>>, %arg4: memref<16x4xf32, #tpu.memory_space<vmem>>, %arg5: memref<16x1xf32, #tpu.memory_space<vmem>>, %arg6: memref<1x16x256xf32, #tpu.memory_space<vmem>>) attributes {dimension_semantics = [#tpu.dimension_semantics<parallel>], iteration_bounds = array<i64: 2>, scalar_prefetch = 0 : i64, scratch_operands = 0 : i64, tpu.core_type = #tpu.core_type<tc>, window_params = [{transform_indices = @transform_0, window_bounds = array<i64: 1, 16, 256>}, {pipeline_mode = #tpu.pipeline_mode<synchronous>, transform_indices = @transform_1, window_bounds = array<i64: 4, 16>}, {pipeline_mode = #tpu.pipeline_mode<synchronous>, transform_indices = @transform_2, window_bounds = array<i64: 4, 1>}, {pipeline_mode = #tpu.pipeline_mode<synchronous>, transform_indices = @transform_3, window_bounds = array<i64: 16, 4>}, {pipeline_mode = #tpu.pipeline_mode<synchronous>, transform_indices = @transform_4, window_bounds = array<i64: 16, 1>}, {transform_indices = @transform_5, window_bounds = array<i64: 1, 16, 256>}]} {
    %c0 = arith.constant 0 : index
    %c0_0 = arith.constant 0 : index
    %c0_1 = arith.constant 0 : index
    %0 = vector.load %arg1[%c0, %c0_0, %c0_1] : memref<1x16x256xf32, #tpu.memory_space<vmem>>, vector<1x16x256xf32>
    %1 = vector.shape_cast %0 : vector<1x16x256xf32> to vector<16x256xf32>
    %cst = arith.constant dense<0.000000e+00> : vector<16xf32>
    %2 = vector.multi_reduction <add>, %1, %cst [1] : vector<16x256xf32> to vector<16xf32>
    %3 = vector.shape_cast %2 : vector<16xf32> to vector<16x1xf32>
    %cst_2 = arith.constant 3.906250e-03 : f32
    %4 = vector.broadcast %cst_2 : f32 to vector<16x1xf32>
    %5 = arith.mulf %3, %4 : vector<16x1xf32>
    %c0_3 = arith.constant 0 : index
    %c0_4 = arith.constant 0 : index
    %6 = vector.load %arg2[%c0_3, %c0_4] : memref<4x16xf32, #tpu.memory_space<vmem>>, vector<4x16xf32>
    %cst_5 = arith.constant dense<0.000000e+00> : vector<4x1xf32>
    %7 = tpu.matmul %6, %5, %cst_5 {dimension_numbers = #tpu.dot_dimension_numbers<[1], [0], [0], [1], [0, 0, 1, 1], [], []>} : vector<4x16xf32>, vector<16x1xf32>, vector<4x1xf32> -> vector<4x1xf32>
    %c0_6 = arith.constant 0 : index
    %c0_7 = arith.constant 0 : index
    %8 = vector.load %arg3[%c0_6, %c0_7] : memref<4x1xf32, #tpu.memory_space<vmem>>, vector<4x1xf32>
    %9 = arith.addf %7, %8 : vector<4x1xf32>
    %cst_8 = arith.constant 0.000000e+00 : f32
    %10 = vector.broadcast %cst_8 : f32 to vector<4x1xf32>
    %11 = arith.maximumf %9, %10 : vector<4x1xf32>
    %c0_9 = arith.constant 0 : index
    %c0_10 = arith.constant 0 : index
    %12 = vector.load %arg4[%c0_9, %c0_10] : memref<16x4xf32, #tpu.memory_space<vmem>>, vector<16x4xf32>
    %cst_11 = arith.constant dense<0.000000e+00> : vector<16x1xf32>
    %13 = tpu.matmul %12, %11, %cst_11 {dimension_numbers = #tpu.dot_dimension_numbers<[1], [0], [0], [1], [0, 0, 1, 1], [], []>} : vector<16x4xf32>, vector<4x1xf32>, vector<16x1xf32> -> vector<16x1xf32>
    %c0_12 = arith.constant 0 : index
    %c0_13 = arith.constant 0 : index
    %14 = vector.load %arg5[%c0_12, %c0_13] : memref<16x1xf32, #tpu.memory_space<vmem>>, vector<16x1xf32>
    %15 = arith.addf %13, %14 : vector<16x1xf32>
    %16 = arith.negf %15 : vector<16x1xf32>
    %17 = math.exp %16 : vector<16x1xf32>
    %cst_14 = arith.constant 1.000000e+00 : f32
    %18 = vector.broadcast %cst_14 : f32 to vector<16x1xf32>
    %19 = arith.addf %18, %17 : vector<16x1xf32>
    %20 = arith.divf %18, %19 : vector<16x1xf32>
    %21 = vector.broadcast %20 : vector<16x1xf32> to vector<16x256xf32>
    %22 = arith.mulf %1, %21 : vector<16x256xf32>
    %c0_15 = arith.constant 0 : index
    %c0_16 = arith.constant 0 : index
    %c0_17 = arith.constant 0 : index
    %23 = vector.load %arg6[%c0_15, %c0_16, %c0_17] : memref<1x16x256xf32, #tpu.memory_space<vmem>>, vector<1x16x256xf32>
    %24 = vector.shape_cast %23 : vector<1x16x256xf32> to vector<16x256xf32>
    %25 = vector.shape_cast %22 : vector<16x256xf32> to vector<1x16x256xf32>
    tpu.vector_store %arg6[%c0_15, %c0_16, %c0_17], %25 {strides = array<i32>} : memref<1x16x256xf32, #tpu.memory_space<vmem>>, vector<1x16x256xf32>,
    return
  }
  func.func @transform_0(%arg0: i32) -> (i32, i32, i32) {
    %c0_i32 = arith.constant 0 : i32
    %c0_i32_0 = arith.constant 0 : i32
    %c0_i32_1 = arith.constant 0 : i32
    return %arg0, %c0_i32, %c0_i32_0 : i32, i32, i32
  }
  func.func @transform_1(%arg0: i32) -> (i32, i32) {
    %c0_i32 = arith.constant 0 : i32
    %c0_i32_0 = arith.constant 0 : i32
    %c0_i32_1 = arith.constant 0 : i32
    return %c0_i32, %c0_i32_0 : i32, i32
  }
  func.func @transform_2(%arg0: i32) -> (i32, i32) {
    %c0_i32 = arith.constant 0 : i32
    %c0_i32_0 = arith.constant 0 : i32
    %c0_i32_1 = arith.constant 0 : i32
    return %c0_i32, %c0_i32_0 : i32, i32
  }
  func.func @transform_3(%arg0: i32) -> (i32, i32) {
    %c0_i32 = arith.constant 0 : i32
    %c0_i32_0 = arith.constant 0 : i32
    %c0_i32_1 = arith.constant 0 : i32
    return %c0_i32, %c0_i32_0 : i32, i32
  }
  func.func @transform_4(%arg0: i32) -> (i32, i32) {
    %c0_i32 = arith.constant 0 : i32
    %c0_i32_0 = arith.constant 0 : i32
    %c0_i32_1 = arith.constant 0 : i32
    return %c0_i32, %c0_i32_0 : i32, i32
  }
  func.func @transform_5(%arg0: i32) -> (i32, i32, i32) {
    %c0_i32 = arith.constant 0 : i32
    %c0_i32_0 = arith.constant 0 : i32
    %c0_i32_1 = arith.constant 0 : i32
    return %arg0, %c0_i32, %c0_i32_0 : i32, i32, i32
  }
}

</mosaic_0001>

<bundles_post_ra>
// kernel: channel_attention.1
= control target key start
LH: loop header
LB: loop body
LE: loop exit
PB: predicated region body
PF: predicated region fallthrough
CT: control target
= control target key end

     0   :  { %s491_s18 = smov 0   ;;  %s549_s0 = inlined_call_operand.vmem [shape: f32[2,16,256], index: 0, kind: input, shape index: {}]   ;;  %s550_s1 = inlined_call_operand.vmem [shape: f32[4,16], index: 1, kind: input, shape index: {}]   ;;  %s551_s2 = inlined_call_operand.vmem [shape: f32[4,1], index: 2, kind: input, shape index: {}]   ;;  %s552_s3 = inlined_call_operand.vmem [shape: f32[16,4], index: 3, kind: input, shape index: {}]   ;;  %s553_s4 = inlined_call_operand.vmem [shape: f32[16,1], index: 4, kind: input, shape index: {}]   ;;  %s554_s5 = inlined_call_operand.vmem [shape: f32[2,16,256], index: 5, kind: output, shape index: {}]  }
   0x1 LB: > { %s413_s19 = sadd.s32 4294967295, %s458_s18   ;;  %p417_p0 = scmp.ge.s32.totalorder %s458_s18, 1  ;;  %s458_s18 = sphi %s491_s18, %s15_s18  }
   0x2   : > { %p187_p1 = scmp.lt.s32.totalorder %s458_s18, 3 }
   0x4   : > { %p188_p2 = pnand %p417_p0, %p187_p1 }
   0x5   : > { %p215_p3 = scmp.lt.s32.totalorder (!%p188_p2), %s413_s19, 1 }
   0x6   : > { %191 = sbr.rel (%p188_p2) target bundleno = 558 (0x22e), region = 40 }
   0xb   : > { %s556_s19 = smov (!%p215_p3, %s413_s19), 1  ;;  %v237_v10 = vld [vmem:[%s550_s1] sm:$0xf]  ;;  %vm239_vm0 = vcmask 130048   ;;  %vm275_vm1 = vcmask 1043456   ;;  %vm268_vm2 = vcmask 31744  }
   0xc   : > { %s430_s20 = sshll.u32 %s556_s19, 5  ;;  %v238_v11 = vld [vmem:[%s551_s2] sm:$0xf]  ;;  %v265_v16 = vld [vmem:[%s552_s3 + $0x8] sm:$0xff]  ;;  %v460_v17 = vmov 0  }
   0xd   : > { %s219_s23 = scalar_lea.vmem %s549_s0, %s430_s20  ;;  %v264_v15 = vld [vmem:[%s552_s3] sm:$0xff]  ;;  %442 = vset.pattern.permute.xlu1 %v460_v17  ;;  %443 = vset.pattern.permute.xlu0 %v460_v17  ;;  %v267_v22 = vld [vmem:[%s553_s4 + $0x8] sm:$0xff]  ;;  %s224_s13 = scalar_lea.vmem %s554_s5, %s430_s20 }
   0xe   : > { %v507_v0 = vld [vmem:[%s219_s23 + $0x10] sm:$0xff]  ;;  %v509_v1 = vld [vmem:[%s219_s23 + $0x18] sm:$0xff]  ;;  %v513_v3 = vld [vmem:[%s219_s23] sm:$0xff] }
   0xf   : > { %v232_v2 = vadd.f32 %v509_v1, %v507_v0  ;;  %v515_v4 = vld [vmem:[%s219_s23 + $0x8] sm:$0xff]  ;;  %v266_v18 = vld [vmem:[%s553_s4] sm:$0xff] }
  0x10   : > { %v229_v5 = vadd.f32 %v515_v4, %v513_v3 }
  0x11   : > { %233 = vadd.xlane.f32.xlu0 %v232_v2 }
  0x19   : > { %230 = vadd.xlane.f32.xlu0 %v229_v5 }
  0x84   : > { %v234_v6 = vpop.xlane.xlu0 %233 }
  0x85   : > { %v236_v7 = vmul.f32 0.00390625, %v234_v6 }
  0x87   : > { %257 = vmatpush.msra.mxu0 %v236_v7 }
  0x8c   : > { %v231_v8 = vpop.xlane.xlu0 %230 }
  0x8d   : > { %v235_v9 = vmul.f32 0.00390625, %v231_v8 }
  0x8f   : > { %258 = vmatpush.msra.mxu0 %v235_v9 }
  0x90   : > { %422 = vmatmul.msk.f32.vlgmr.msra.gmra.mxu0 %vm239_vm0, %v237_v10 }
 0x10d   : > { %v260_v12 = vpop.f32.mrf.mxu0 }
 0x10e   : > { %v261_v13 = vadd.f32 %v260_v12, %v238_v11 }
 0x110   : > { %v263_v14 = vmax.f32 %v261_v13, 0.0 }
 0x112   : > { %423 = vmatpush.msk.msra.mxu1 %vm275_vm1, %v263_v14  ;;  %432 = vmatpush.msk.msra.mxu2 %vm275_vm1, %v263_v14 }
 0x113   : > { %424 = vmatmul.msk.f32.vlgmr.msra.gmra.mxu1 %vm268_vm2, %v264_v15  ;;  %425 = vmatmul.msk.f32.vlgmr.msra.gmra.mxu2 %vm268_vm2, %v265_v16 }
 0x190   : > { %v296_v19 = vpop.f32.mrf.mxu1 }
 0x191   : > { %v297_v20 = vadd.f32 %v296_v19, %v266_v18 }
 0x193   : > { %v426_v21 = vmul.f32 -1.442695, %v297_v20 }
 0x195   : > { %444 = vpow2.f32 %v426_v21 }
 0x196   : > { %v299_v23 = vpop.f32.mrf.mxu2 }
 0x197   : > { %v300_v24 = vadd.f32 %v299_v23, %v267_v22 }
 0x199   : > { %v427_v25 = vmul.f32 -1.442695, %v300_v24 }
 0x19b   : > { %v445_v26 = vpop.eup %444  ;;  %446 = vpow2.f32 %v427_v25 }
 0x19c   : > { %v308_v27 = vadd.f32 1.0, %v445_v26 }
 0x19e   : > { %448 = vrcp.f32 %v308_v27  ;;  %v321_v33 = vand.u32 2147483648, %v308_v27  ;;  %v319_v35 = vand.u32 2147483647, %v308_v27  ;;  %vm315_vm4 = vweird.f32 %v308_v27 }
 0x1a0   : > { %v322_v39 = vor.u32 1.1754944e-38, %v321_v33  ;;  %vm320_vm6 = vcmp.eq.f32.partialorder %v319_v35, 8.507059e+37 }
 0x1a1   : > { %v447_v28 = vpop.eup %446 }
 0x1a2   : > { %v309_v29 = vadd.f32 1.0, %v447_v28 }
 0x1a4   : > { %v449_v30 = vpop.eup %448  ;;  %450 = vrcp.f32 %v309_v29  ;;  %v336_v44 = vand.u32 2147483648, %v309_v29  ;;  %vm330_vm8 = vweird.f32 %v309_v29  ;;  %v334_v46 = vand.u32 2147483647, %v309_v29 }
 0x1a5   : > { %v311_v31 = vmul.f32 %v449_v30, %v308_v27  ;;  %vm316_vm3 = vweird.f32 %v449_v30 }
 0x1a6   : > { %vm317_vm5 = vmor %vm315_vm4, %vm316_vm3  ;;  %v337_v48 = vor.u32 1.1754944e-38, %v336_v44  ;;  %vm335_vm10 = vcmp.eq.f32.partialorder %v334_v46, 8.507059e+37 }
 0x1a7   : > { %v312_v32 = vsub.f32 1.0, %v311_v31 }
 0x1a9   : > { %v313_v34 = vmul.f32 %v449_v30, %v312_v32 }
 0x1aa   : > { %v451_v36 = vpop.eup %450 }
 0x1ab   : > { %v314_v37 = vadd.f32 %v449_v30, %v313_v34  ;;  %v326_v38 = vmul.f32 %v451_v36, %v309_v29  ;;  %vm331_vm7 = vweird.f32 %v451_v36 }
 0x1ac   : > { %vm332_vm9 = vmor %vm330_vm8, %vm331_vm7 }
 0x1ad   : > { %v318_v40 = vsel %vm317_vm5, %v449_v30, %v314_v37  ;;  %v327_v41 = vsub.f32 1.0, %v326_v38 }
 0x1ae   : > { %v323_v42 = vsel %vm320_vm6, %v322_v39, %v318_v40 }
 0x1af   : > { %342 = vperm.xlu1 %442, %v323_v42   ;;  %v328_v43 = vmul.f32 %v451_v36, %v327_v41 }
 0x1b1   : > { %v329_v45 = vadd.f32 %v451_v36, %v328_v43 }
 0x1b3   : > { %v333_v47 = vsel %vm332_vm9, %v451_v36, %v329_v45 }
 0x1b4   : > { %v338_v49 = vsel %vm335_vm10, %v337_v48, %v333_v47 }
 0x1b7   : > { %347 = vperm.xlu1 %442, %v338_v49  }
 0x221   : > { %v343_v50 = vpop.permute.xlu1 %342 }
 0x222   : > { %v350_v51 = vmul.f32 %v343_v50, %v513_v3  ;;  %v351_v52 = vmul.f32 %v343_v50, %v515_v4 }
 0x224   : > { %354 = vst [vmem:[%s224_s13] sm:$0xff] %v350_v51 }
 0x225   : > { %355 = vst [vmem:[%s224_s13 + $0x8] sm:$0xff] %v351_v52 }
 0x229   : > { %v348_v53 = vpop.permute.xlu1 %347 }
 0x22a   : > { %v352_v54 = vmul.f32 %v348_v53, %v507_v0  ;;  %v353_v55 = vmul.f32 %v348_v53, %v509_v1 }
 0x22c   : > { %356 = vst [vmem:[%s224_s13 + $0x10] sm:$0xff] %v352_v54 }
 0x22d   : > { %357 = vst [vmem:[%s224_s13 + $0x18] sm:$0xff] %v353_v55 }
 0x22e PF: > { %s15_s18 = sadd.s32 1, %s458_s18  }
 0x22f   : > { %p12_p4 = scmp.ge.s32.totalorder %s15_s18, 4  }
 0x231   :  { %14 = sbr.rel (!%p12_p4) target bundleno = 1 (0x1), region = 70 }

</bundles_post_ra>
